<compile_context>
chip_gen: v5e
topology: v5e:2x2
jax: 0.10.0
libtpu: 0.0.40
codegen_flags: <defaults>
</compile_context>

<pallas_src>
import functools
import math

import jax
import jax.numpy as jnp
from jax.experimental import pallas as pl
from jax.experimental.pallas import tpu as pltpu


def _attn_kernel(*refs, scale, causal, block_q, block_k, has_bias):
    if has_bias:
        q_ref, kt_ref, v_ref, bias_ref, o_ref, m_sc, l_sc, acc_sc = refs
    else:
        q_ref, kt_ref, v_ref, o_ref, m_sc, l_sc, acc_sc = refs
        bias_ref = None

    qi = pl.program_id(1)
    ki = pl.program_id(2)

    @pl.when(ki == 0)
    def _init():
        m_sc[...] = jnp.full_like(m_sc, -jnp.inf)
        l_sc[...] = jnp.zeros_like(l_sc)
        acc_sc[...] = jnp.zeros_like(acc_sc)

    def body(apply_causal_mask):
        q = q_ref[0] * scale                       # (tq, D) — scale folded into Q
        kt = kt_ref[0]                             # (D, tk) — pre-transposed K
        v = v_ref[0]                               # (tk, D)

        # scores = (q * scale) @ K^T  -> f32 (tq, tk) on the MXU, no XLU transpose
        s = jax.lax.dot_general(q, kt, (((1,), (0,)), ((), ())),
                                preferred_element_type=jnp.float32)

        if bias_ref is not None:
            # (1, tk) bias slice for this KV tile, sublane-indexed from the
            # per-head resident bias row; broadcasts over query rows.
            s = s + bias_ref[0, pl.ds(ki, 1), :].astype(jnp.float32)

        if apply_causal_mask:
            rows = qi * block_q + jax.lax.broadcasted_iota(
                jnp.int32, (block_q, block_k), 0)
            cols = ki * block_k + jax.lax.broadcasted_iota(
                jnp.int32, (block_q, block_k), 1)
            s = s + jnp.where(cols > rows, -10000.0, 0.0).astype(jnp.float32)

        # Online softmax update.
        m_prev = m_sc[...]                                      # (tq, 1)
        m_new = jnp.maximum(m_prev, s.max(axis=-1, keepdims=True))
        alpha = jnp.exp(m_prev - m_new)
        p = jnp.exp(s - m_new)                                  # (tq, tk)
        l_sc[...] = alpha * l_sc[...] + p.sum(axis=-1, keepdims=True)
        acc_sc[...] = alpha * acc_sc[...] + jax.lax.dot_general(
            p.astype(v.dtype), v, (((1,), (0,)), ((), ())),
            preferred_element_type=jnp.float32)
        m_sc[...] = m_new

    if causal:
        # Tile categories (top-left aligned mask: col > row is masked out):
        col_min = ki * block_k
        col_max = (ki + 1) * block_k - 1
        row_min = qi * block_q
        row_max = (qi + 1) * block_q - 1
        fully_unmasked = col_max <= row_min        # no mask math needed
        fully_masked = col_min > row_max           # skip tile entirely

        @pl.when(fully_unmasked)
        def _():
            body(False)

        @pl.when(jnp.logical_and(jnp.logical_not(fully_unmasked),
                                 jnp.logical_not(fully_masked)))
        def _():
            body(True)
        # fully-masked tiles: no compute; their K/V DMA is also suppressed by
        # the clamped KV block index in the wrapper's index_maps.
    else:
        body(False)

    @pl.when(ki == pl.num_programs(2) - 1)
    def _finish():
        inv_l = pl.reciprocal(l_sc[...], approx=True)       # EUP slot
        inv_l = inv_l * (2.0 - l_sc[...] * inv_l)            # one NR step -> ~f32
        o_ref[0] = (acc_sc[...] * inv_l).astype(o_ref.dtype)


def cross_attention(q, kv, *, causal=False, softmax_scale=None,
                    key_padding_mask=None, block_q=256, block_k=256):
    """q: (B, Sq, H, D); kv: (B, Sk, 2, H, D); key_padding_mask: (B, Sk) bool
    (True = keep).  Returns (B, Sq, H, D)."""
    B, Sq, H, D = q.shape
    Sk = kv.shape[1]
    assert kv.shape == (B, Sk, 2, H, D)
    scale = softmax_scale if softmax_scale is not None else 1.0 / math.sqrt(D)

    k = kv[:, :, 0]                                # (B, Sk, H, D)
    v = kv[:, :, 1]

    # Head-major slabs.  K is stored pre-transposed (B*H, D, Sk) so the
    # in-kernel score matmul needs no per-tile XLU transpose.
    qh = jnp.transpose(q, (0, 2, 1, 3)).reshape(B * H, Sq, D)
    kth = jnp.transpose(k, (0, 2, 3, 1)).reshape(B * H, D, Sk)
    vh = jnp.transpose(v, (0, 2, 1, 3)).reshape(B * H, Sk, D)

    def _round_up(x, m):
        return (x + m - 1) // m * m

    # Tile sizes: 256 at scale (fills the v6e/v7x 256x256 MXU, minimizes K/V
    # re-streaming), collapsing to a single sublane-aligned block for short
    # sequences so the grid doesn't degenerate into tiny overhead-bound steps.
    Sq_p = _round_up(Sq, 8)
    Sk_p = _round_up(Sk, 8)
    tq = min(block_q, Sq_p)
    tk = min(block_k, Sk_p)
    Sq_p = _round_up(Sq_p, tq)
    Sk_p = _round_up(Sk_p, tk)

    if Sq_p != Sq:
        qh = jnp.pad(qh, ((0, 0), (0, Sq_p - Sq), (0, 0)))
    if Sk_p != Sk:
        kth = jnp.pad(kth, ((0, 0), (0, 0), (0, Sk_p - Sk)))
        vh = jnp.pad(vh, ((0, 0), (0, Sk_p - Sk), (0, 0)))

    nq = Sq_p // tq
    nk = Sk_p // tk
    grid = (B * H, nq, nk)

    # Causal pruning: clamp the KV block index so fully-masked tiles never
    # trigger a fresh DMA (Pallas skips the copy when the block index repeats).
    if causal:
        def kv_blk(qi, ki):
            return jnp.minimum(ki, ((qi + 1) * tq - 1) // tk)
    else:
        def kv_blk(qi, ki):
            return ki

    in_specs = [
        pl.BlockSpec((1, tq, D), lambda bh, qi, ki: (bh, qi, 0)),             # q
        pl.BlockSpec((1, D, tk), lambda bh, qi, ki: (bh, 0, kv_blk(qi, ki))),  # k^T
        pl.BlockSpec((1, tk, D), lambda bh, qi, ki: (bh, kv_blk(qi, ki), 0)),  # v
    ]
    args = [qh, kth, vh]

    # Additive key bias: -10000 for user-masked keys (PyTorch parity), -1e30
    # for artificial trailing padding columns (exactly zero weight after exp
    # underflow).  Omitted entirely when neither is needed.
    has_bias = (key_padding_mask is not None) or (Sk_p != Sk)
    if has_bias:
        if key_padding_mask is None:
            bias = jnp.zeros((B, Sk), jnp.float32)
        else:
            bias = jnp.where(key_padding_mask, 0.0, -10000.0).astype(jnp.float32)
        if Sk_p != Sk:
            bias = jnp.pad(bias, ((0, 0), (0, Sk_p - Sk)), constant_values=-1e30)
        bias = bias.reshape(B, nk, tk)             # whole row resident per head
        in_specs.append(
            pl.BlockSpec((1, nk, tk), lambda bh, qi, ki: (bh // H, 0, 0)))
        args.append(bias)

    kernel = functools.partial(_attn_kernel, scale=scale, causal=causal,
                               block_q=tq, block_k=tk, has_bias=has_bias)

    itemsize = jnp.dtype(q.dtype).itemsize
    causal_frac = 0.5 if causal else 1.0
    q_bytes = B * H * Sq_p * D * itemsize
    o_bytes = B * H * Sq_p * D * itemsize
    kv_bytes = 2 * B * H * Sk_p * D * itemsize      # K + V, re-streamed nq times
    cost = pl.CostEstimate(
        flops=int(4 * B * H * Sq_p * Sk_p * D * causal_frac),       # QK^T + PV
        transcendentals=int(B * H * Sq_p * Sk_p * causal_frac),     # exp
        bytes_accessed=int(q_bytes + o_bytes + nq * kv_bytes * causal_frac
                           + (B * Sk_p * 4 if has_bias else 0)),
    )

    out = pl.pallas_call(
        kernel,
        out_shape=jax.ShapeDtypeStruct((B * H, Sq_p, D), q.dtype),
        grid_spec=pltpu.PrefetchScalarGridSpec(
            num_scalar_prefetch=0,
            grid=grid,
            in_specs=in_specs,
            out_specs=pl.BlockSpec((1, tq, D), lambda bh, qi, ki: (bh, qi, 0)),
            scratch_shapes=[
                pltpu.VMEM((tq, 1), jnp.float32),   # running max m
                pltpu.VMEM((tq, 1), jnp.float32),   # running denom l
                pltpu.VMEM((tq, D), jnp.float32),   # output accumulator
            ],
        ),
        compiler_params=pltpu.CompilerParams(
            dimension_semantics=("parallel", "parallel", "arbitrary")),
        cost_estimate=cost,
    )(*args)

    out = out[:, :Sq, :]
    return out.reshape(B, H, Sq, D).transpose(0, 2, 1, 3)


def _reference(q, kv, *, causal=False, softmax_scale=None,
               key_padding_mask=None):
    """Plain-JAX mirror of the PyTorch CrossAttention.forward (f32 math)."""
    q = q.astype(jnp.float32)
    kv = kv.astype(jnp.float32)
    B, Sq, H, D = q.shape
    Sk = kv.shape[1]
    k = kv[:, :, 0]
    v = kv[:, :, 1]
    scale = softmax_scale if softmax_scale is not None else 1.0 / math.sqrt(D)
    scores = jnp.einsum('bthd,bshd->bhts', q, k * scale,
                        precision=jax.lax.Precision.HIGHEST)
    if key_padding_mask is not None:
        pad = jnp.where(key_padding_mask, 0.0, -10000.0).astype(scores.dtype)
        scores = scores + pad[:, None, None, :]
    if causal:
        cm = jnp.triu(jnp.full((Sq, Sk), -10000.0, dtype=scores.dtype), 1)
        scores = scores + cm
    attn = jax.nn.softmax(scores, axis=-1)
    return jnp.einsum('bhts,bshd->bthd', attn, v,
                      precision=jax.lax.Precision.HIGHEST)


if __name__ == "__main__":
    key = jax.random.PRNGKey(0)

    # ---- Case 1: small, no masks, f32 -------------------------------------
    B, Sq, Sk, H, D = 2, 8, 8, 4, 32
    k1, k2, key = jax.random.split(key, 3)
    q = jax.random.normal(k1, (B, Sq, H, D), dtype=jnp.float32)
    kv = jax.random.normal(k2, (B, Sk, 2, H, D), dtype=jnp.float32)
    out = jax.block_until_ready(cross_attention(q, kv))
    ref = _reference(q, kv)
    assert jnp.allclose(out, ref, atol=2e-4, rtol=2e-4), "mismatch (no mask)"

    # ---- Case 2: small, causal + key padding mask, f32 --------------------
    lens = jnp.array([6, 8])
    mask = jnp.arange(Sk)[None, :] < lens[:, None]            # (B, Sk) bool
    out_c = jax.block_until_ready(
        cross_attention(q, kv, causal=True, key_padding_mask=mask))
    ref_c = _reference(q, kv, causal=True, key_padding_mask=mask)
    assert jnp.allclose(out_c, ref_c, atol=2e-4, rtol=2e-4), "mismatch (masked)"

    # ---- Case 3: multi-tile f32, causal pruning + seq padding exercised ----
    B3, S3, H3, D3 = 1, 320, 2, 64
    k3, k4, key = jax.random.split(key, 3)
    q3 = jax.random.normal(k3, (B3, S3, H3, D3), dtype=jnp.float32)
    kv3 = jax.random.normal(k4, (B3, S3, 2, H3, D3), dtype=jnp.float32)
    mask3 = jnp.arange(S3)[None, :] < jnp.array([288])[:, None]
    out3 = jax.block_until_ready(
        cross_attention(q3, kv3, causal=True, key_padding_mask=mask3,
                        block_q=128, block_k=128))
    ref3 = _reference(q3, kv3, causal=True, key_padding_mask=mask3)
    assert jnp.allclose(out3, ref3, atol=2e-4, rtol=2e-4), "mismatch (multi-tile)"

    # ---- Case 4: bf16 inputs, default 256 tiles, causal + padding ---------
    q4 = q3.astype(jnp.bfloat16)
    kv4 = kv3.astype(jnp.bfloat16)
    out4 = jax.block_until_ready(
        cross_attention(q4, kv4, causal=True, key_padding_mask=mask3))
    ref4 = _reference(q4, kv4, causal=True, key_padding_mask=mask3)
    assert jnp.allclose(out4.astype(jnp.float32), ref4,
                        atol=3e-2, rtol=3e-2), "mismatch (bf16)"

    print("KERNEL_OK")
</pallas_src>

<mosaic_0001>
module attributes {stable_mosaic.version = 11 : i64} {
  func.func @_attn_kernel(%arg0: i32, %arg1: i32, %arg2: i32, %arg3: memref<1x8x32xf32, #tpu.memory_space<vmem>>, %arg4: memref<1x32x8xf32, #tpu.memory_space<vmem>>, %arg5: memref<1x8x32xf32, #tpu.memory_space<vmem>>, %arg6: memref<1x8x32xf32, #tpu.memory_space<vmem>>, %arg7: memref<8x1xf32, #tpu.memory_space<vmem>>, %arg8: memref<8x1xf32, #tpu.memory_space<vmem>>, %arg9: memref<8x32xf32, #tpu.memory_space<vmem>>) attributes {dimension_semantics = [#tpu.dimension_semantics<parallel>, #tpu.dimension_semantics<parallel>, #tpu.dimension_semantics<arbitrary>], iteration_bounds = array<i64: 8, 1, 1>, scalar_prefetch = 0 : i64, scratch_operands = 3 : i64, tpu.core_type = #tpu.core_type<tc>, window_params = [{transform_indices = @transform_0, window_bounds = array<i64: 1, 8, 32>}, {transform_indices = @transform_1, window_bounds = array<i64: 1, 32, 8>}, {transform_indices = @transform_2, window_bounds = array<i64: 1, 8, 32>}, {transform_indices = @transform_3, window_bounds = array<i64: 1, 8, 32>}]} {
    %c0_i32 = arith.constant 0 : i32
    %0 = arith.cmpi eq, %arg2, %c0_i32 : i32
    %1 = arith.extui %0 : i1 to i32
    %c0_i32_0 = arith.constant 0 : i32
    %2 = arith.cmpi ne, %1, %c0_i32_0 : i32
    scf.if %2 {
      %cst_27 = arith.constant 0xFF800000 : f32
      %37 = vector.broadcast %cst_27 : f32 to vector<8x1xf32>
      %c0_28 = arith.constant 0 : index
      %c0_29 = arith.constant 0 : index
      %38 = vector.load %arg7[%c0_28, %c0_29] : memref<8x1xf32, #tpu.memory_space<vmem>>, vector<8x1xf32>
      tpu.vector_store %arg7[%c0_28, %c0_29], %37 {strides = array<i32>} : memref<8x1xf32, #tpu.memory_space<vmem>>, vector<8x1xf32>,
      %cst_30 = arith.constant 0.000000e+00 : f32
      %39 = vector.broadcast %cst_30 : f32 to vector<8x1xf32>
      %c0_31 = arith.constant 0 : index
      %c0_32 = arith.constant 0 : index
      %40 = vector.load %arg8[%c0_31, %c0_32] : memref<8x1xf32, #tpu.memory_space<vmem>>, vector<8x1xf32>
      tpu.vector_store %arg8[%c0_31, %c0_32], %39 {strides = array<i32>} : memref<8x1xf32, #tpu.memory_space<vmem>>, vector<8x1xf32>,
      %cst_33 = arith.constant 0.000000e+00 : f32
      %41 = vector.broadcast %cst_33 : f32 to vector<8x32xf32>
      %c0_34 = arith.constant 0 : index
      %c0_35 = arith.constant 0 : index
      %42 = vector.load %arg9[%c0_34, %c0_35] : memref<8x32xf32, #tpu.memory_space<vmem>>, vector<8x32xf32>
      tpu.vector_store %arg9[%c0_34, %c0_35], %41 {strides = array<i32>} : memref<8x32xf32, #tpu.memory_space<vmem>>, vector<8x32xf32>,
    } else {
    }
    %c0 = arith.constant 0 : index
    %c0_1 = arith.constant 0 : index
    %c0_2 = arith.constant 0 : index
    %3 = vector.load %arg3[%c0, %c0_1, %c0_2] : memref<1x8x32xf32, #tpu.memory_space<vmem>>, vector<1x8x32xf32>
    %4 = vector.shape_cast %3 : vector<1x8x32xf32> to vector<8x32xf32>
    %cst = arith.constant 0.176776692 : f32
    %5 = vector.broadcast %cst : f32 to vector<8x32xf32>
    %6 = arith.mulf %4, %5 : vector<8x32xf32>
    %c0_3 = arith.constant 0 : index
    %c0_4 = arith.constant 0 : index
    %c0_5 = arith.constant 0 : index
    %7 = vector.load %arg4[%c0_3, %c0_4, %c0_5] : memref<1x32x8xf32, #tpu.memory_space<vmem>>, vector<1x32x8xf32>
    %8 = vector.shape_cast %7 : vector<1x32x8xf32> to vector<32x8xf32>
    %c0_6 = arith.constant 0 : index
    %c0_7 = arith.constant 0 : index
    %c0_8 = arith.constant 0 : index
    %9 = vector.load %arg5[%c0_6, %c0_7, %c0_8] : memref<1x8x32xf32, #tpu.memory_space<vmem>>, vector<1x8x32xf32>
    %10 = vector.shape_cast %9 : vector<1x8x32xf32> to vector<8x32xf32>
    %cst_9 = arith.constant dense<0.000000e+00> : vector<8x8xf32>
    %11 = tpu.matmul %6, %8, %cst_9 {dimension_numbers = #tpu.dot_dimension_numbers<[1], [0], [0], [1], [0, 0, 1, 1], [], []>} : vector<8x32xf32>, vector<32x8xf32>, vector<8x8xf32> -> vector<8x8xf32>
    %c0_10 = arith.constant 0 : index
    %c0_11 = arith.constant 0 : index
    %12 = vector.load %arg7[%c0_10, %c0_11] : memref<8x1xf32, #tpu.memory_space<vmem>>, vector<8x1xf32>
    %cst_12 = arith.constant dense<0xFF800000> : vector<8xf32>
    %13 = vector.multi_reduction <maximumf>, %11, %cst_12 [1] : vector<8x8xf32> to vector<8xf32>
    %14 = vector.shape_cast %13 : vector<8xf32> to vector<8x1xf32>
    %15 = arith.maximumf %12, %14 : vector<8x1xf32>
    %16 = arith.subf %12, %15 : vector<8x1xf32>
    %17 = math.exp %16 : vector<8x1xf32>
    %18 = vector.broadcast %15 : vector<8x1xf32> to vector<8x8xf32>
    %19 = arith.subf %11, %18 : vector<8x8xf32>
    %20 = math.exp %19 : vector<8x8xf32>
    %c0_13 = arith.constant 0 : index
    %c0_14 = arith.constant 0 : index
    %21 = vector.load %arg8[%c0_13, %c0_14] : memref<8x1xf32, #tpu.memory_space<vmem>>, vector<8x1xf32>
    %22 = arith.mulf %17, %21 : vector<8x1xf32>
    %cst_15 = arith.constant dense<0.000000e+00> : vector<8xf32>
    %23 = vector.multi_reduction <add>, %20, %cst_15 [1] : vector<8x8xf32> to vector<8xf32>
    %24 = vector.shape_cast %23 : vector<8xf32> to vector<8x1xf32>
    %25 = arith.addf %22, %24 : vector<8x1xf32>
    %c0_16 = arith.constant 0 : index
    %c0_17 = arith.constant 0 : index
    %26 = vector.load %arg8[%c0_16, %c0_17] : memref<8x1xf32, #tpu.memory_space<vmem>>, vector<8x1xf32>
    tpu.vector_store %arg8[%c0_16, %c0_17], %25 {strides = array<i32>} : memref<8x1xf32, #tpu.memory_space<vmem>>, vector<8x1xf32>,
    %c0_18 = arith.constant 0 : index
    %c0_19 = arith.constant 0 : index
    %27 = vector.load %arg9[%c0_18, %c0_19] : memref<8x32xf32, #tpu.memory_space<vmem>>, vector<8x32xf32>
    %28 = vector.broadcast %17 : vector<8x1xf32> to vector<8x32xf32>
    %29 = arith.mulf %28, %27 : vector<8x32xf32>
    %cst_20 = arith.constant dense<0.000000e+00> : vector<8x32xf32>
    %30 = tpu.matmul %20, %10, %cst_20 {dimension_numbers = #tpu.dot_dimension_numbers<[1], [0], [0], [1], [0, 0, 1, 1], [], []>} : vector<8x8xf32>, vector<8x32xf32>, vector<8x32xf32> -> vector<8x32xf32>
    %31 = arith.addf %29, %30 : vector<8x32xf32>
    %c0_21 = arith.constant 0 : index
    %c0_22 = arith.constant 0 : index
    %32 = vector.load %arg9[%c0_21, %c0_22] : memref<8x32xf32, #tpu.memory_space<vmem>>, vector<8x32xf32>
    tpu.vector_store %arg9[%c0_21, %c0_22], %31 {strides = array<i32>} : memref<8x32xf32, #tpu.memory_space<vmem>>, vector<8x32xf32>,
    %c0_23 = arith.constant 0 : index
    %c0_24 = arith.constant 0 : index
    %33 = vector.load %arg7[%c0_23, %c0_24] : memref<8x1xf32, #tpu.memory_space<vmem>>, vector<8x1xf32>
    tpu.vector_store %arg7[%c0_23, %c0_24], %15 {strides = array<i32>} : memref<8x1xf32, #tpu.memory_space<vmem>>, vector<8x1xf32>,
    %c0_i32_25 = arith.constant 0 : i32
    %34 = arith.cmpi eq, %arg2, %c0_i32_25 : i32
    %35 = arith.extui %34 : i1 to i32
    %c0_i32_26 = arith.constant 0 : i32
    %36 = arith.cmpi ne, %35, %c0_i32_26 : i32
    scf.if %36 {
      %c0_27 = arith.constant 0 : index
      %c0_28 = arith.constant 0 : index
      %37 = vector.load %arg8[%c0_27, %c0_28] : memref<8x1xf32, #tpu.memory_space<vmem>>, vector<8x1xf32>
      %38 = tpu.reciprocal %37 {approx = true} : vector<8x1xf32> -> vector<8x1xf32>
      %c0_29 = arith.constant 0 : index
      %c0_30 = arith.constant 0 : index
      %39 = vector.load %arg8[%c0_29, %c0_30] : memref<8x1xf32, #tpu.memory_space<vmem>>, vector<8x1xf32>
      %40 = arith.mulf %39, %38 : vector<8x1xf32>
      %cst_31 = arith.constant 2.000000e+00 : f32
      %41 = vector.broadcast %cst_31 : f32 to vector<8x1xf32>
      %42 = arith.subf %41, %40 : vector<8x1xf32>
      %43 = arith.mulf %38, %42 : vector<8x1xf32>
      %c0_32 = arith.constant 0 : index
      %c0_33 = arith.constant 0 : index
      %44 = vector.load %arg9[%c0_32, %c0_33] : memref<8x32xf32, #tpu.memory_space<vmem>>, vector<8x32xf32>
      %45 = vector.broadcast %43 : vector<8x1xf32> to vector<8x32xf32>
      %46 = arith.mulf %44, %45 : vector<8x32xf32>
      %c0_34 = arith.constant 0 : index
      %c0_35 = arith.constant 0 : index
      %c0_36 = arith.constant 0 : index
      %47 = vector.load %arg6[%c0_34, %c0_35, %c0_36] : memref<1x8x32xf32, #tpu.memory_space<vmem>>, vector<1x8x32xf32>
      %48 = vector.shape_cast %47 : vector<1x8x32xf32> to vector<8x32xf32>
      %49 = vector.shape_cast %46 : vector<8x32xf32> to vector<1x8x32xf32>
      tpu.vector_store %arg6[%c0_34, %c0_35, %c0_36], %49 {strides = array<i32>} : memref<1x8x32xf32, #tpu.memory_space<vmem>>, vector<1x8x32xf32>,
    } else {
    }
    return
  }
  func.func @transform_0(%arg0: i32, %arg1: i32, %arg2: i32) -> (i32, i32, i32) {
    %c0_i32 = arith.constant 0 : i32
    %c0_i32_0 = arith.constant 0 : i32
    return %arg0, %arg1, %c0_i32 : i32, i32, i32
  }
  func.func @transform_1(%arg0: i32, %arg1: i32, %arg2: i32) -> (i32, i32, i32) {
    %c0_i32 = arith.constant 0 : i32
    %c0_i32_0 = arith.constant 0 : i32
    return %arg0, %c0_i32, %arg2 : i32, i32, i32
  }
  func.func @transform_2(%arg0: i32, %arg1: i32, %arg2: i32) -> (i32, i32, i32) {
    %c0_i32 = arith.constant 0 : i32
    %c0_i32_0 = arith.constant 0 : i32
    return %arg0, %arg2, %c0_i32 : i32, i32, i32
  }
  func.func @transform_3(%arg0: i32, %arg1: i32, %arg2: i32) -> (i32, i32, i32) {
    %c0_i32 = arith.constant 0 : i32
    %c0_i32_0 = arith.constant 0 : i32
    return %arg0, %arg1, %c0_i32 : i32, i32, i32
  }
}

</mosaic_0001>

<bundles_post_ra>
// kernel: tpu_custom_call.1
= control target key start
LH: loop header
LB: loop body
LE: loop exit
PB: predicated region body
PF: predicated region fallthrough
CT: control target
= control target key end

     0   :  { %8 = vsyncpa [#allocation6], 0  ;;  %s804_s0 = inlined_call_operand.vmem [shape: f32[8,8,32], index: 0, kind: input, shape index: {}]   ;;  %s805_s1 = inlined_call_operand.vmem [shape: f32[8,32,8], index: 1, kind: input, shape index: {}]   ;;  %s806_s2 = inlined_call_operand.vmem [shape: f32[8,8,32], index: 2, kind: input, shape index: {}]   ;;  %s807_s3 = inlined_call_operand.hbm [shape: f32[8,8,32], index: 3, kind: output, shape index: {}]  }
   0x1   :  { %10 = vsyncpa [#allocation6 + $0x1], 0  ;;  %s682_s12 = smov 0   ;;  %s684_s13 = smov 0  }
   0x2   :  { %s686_s14 = smov 0   ;;  %s688_s15 = smov 0  }
   0x3   :  { %s690_s16 = smov 0   ;;  %s692_s17 = smov 0  }
   0x4 LB: > { %s495_s18 = sadd.s32 4294967295, %s657_s17   ;;  %s496_s19 = sadd.s32 4294967294, %s657_s17   ;;  %s657_s17 = sphi %s692_s17, %s16_s17   ;;  %s653_s16 = sphi %s690_s16, %s814_s16   ;;  %s649_s15 = sphi %s688_s15, %s813_s15   ;;  %s645_s14 = sphi %s686_s14, %s812_s14   ;;  %s641_s13 = sphi %s684_s13, %s811_s13   ;;  %s637_s12 = sphi %s682_s12, %s810_s12  }
   0x5   : > { %s35_s20 = sadd.s32 1, %s653_s16  ;;  %s128_s21 = sadd.s32 1, %s645_s14 }
   0x6   : > { %p37_p0 = scmp.ge.s32.totalorder %s35_s20, 8  ;;  %p138_p1 = scmp.ne.s32.totalorder %s645_s14, %s641_s13 }
   0x7   : > { %p139_p2 = scmp.eq.s32.totalorder %s495_s18, 7  ;;  %p144_p3 = scmp.ne.s32.totalorder %s641_s13, %s637_s12 }
   0x8   : > { %s816_s20 = smov (%p37_p0, %s35_s20), 0  ;;  %p145_p5 = scmp.eq.s32.totalorder %s496_s19, 7 }
   0x9   : > { %p722_p4 = por %p139_p2, %p138_p1  ;;  %s123_s23 = ssub.s32 %s653_s16, %s816_s20 }
   0xa   : > { %p499_p6 = scmp.ge.s32.totalorder %s657_s17, 1  ;;  %p126_p7 = scmp.eq.s32.totalorder %s123_s23, 0 }
   0xb   : > { %p729_p8 = por %p145_p5, %p144_p3  ;;  %p194_p9 = scmp.lt.s32.totalorder %s657_s17, 9 }
   0xc   : > { %s735_s25 = scalar_select %p126_p7, %s645_s14, %s128_s21  }
   0xd   : > { %p195_p10 = pnand %p499_p6, %p194_p9 }
   0xe   : > { %p235_p11 = scmp.lt.s32.totalorder (!%p195_p10), %s649_s15, 7  ;;  %s232_s11 = sand.u32 (!%p195_p10), 1, %s641_s13  }
   0xf   : > { %198 = sbr.rel (%p195_p10) target bundleno = 639 (0x27f), region = 32  ;;  %s500_s18 = sshll.u32 (!%p195_p10), %s232_s11, 3 }
  0x10   : > { %s508_s19 = sshll.u32 (!%p195_p10), %s649_s15, 3  ;;  %s372_s30 = scalar_lea.sflag (!%p195_p10), [#allocation6], %s232_s11 }
  0x14   : > { %vm261_vm0 = vcmask 7168   ;;  %v659_v0 = vmov 0.0   ;;  %vm264_vm1 = vcmask 261120   ;;  %s740_s26 = scalar_select %p235_p11, %s649_s15, 7  ;;  %v660_v7 = vmov -inf  }
  0x15   : > { %263 = vst.msk [vmem:[#allocation3] sm:$0xff] %vm261_vm0, %v659_v0  ;;  %vm298_vm2 = vcmask 64512   ;;  %v661_v10 = vmov 0  }
  0x16   : > { %265 = vst.msk [vmem:[#allocation4] sm:$0xff] %vm264_vm1, %v659_v0  ;;  %s511_s27 = sshll.u32 %s740_s26, 5  ;;  %s501_s28 = sshll.u32 %s740_s26, 3  ;;  %570 = vset.pattern.permute.xlu0 %v661_v10  ;;  %571 = vset.pattern.permute.xlu1 %v661_v10 }
  0x17   : > { %s249_s4 = scalar_lea.vmem %s805_s1, %s511_s27  ;;  %s241_s7 = scalar_lea.vmem %s804_s0, %s501_s28  ;;  %262 = vst.msk [vmem:[#allocation2] sm:$0xff] %vm261_vm0, %v660_v7  ;;  %572 = vset.pattern.permute.xlu2 %v661_v10 }
  0x18   : > { %v271_v1 = vld [vmem:[%s249_s4 + $0x18] sm:$0xff]  ;;  %v270_v2 = vld [vmem:[%s249_s4 + $0x10] sm:$0xff]  ;;  %v266_v3 = vld [vmem:[%s241_s7] sm:$0xff]  ;;  %s256_s10 = scalar_lea.vmem %s806_s2, %s501_s28  ;;  %s383_s26 = scalar_lea.hbm %s807_s3, %s508_s19 }
  0x19   : > { %289 = vmatpush.msra.mxu0 %v271_v1  ;;  %v269_v4 = vld [vmem:[%s249_s4 + $0x8] sm:$0xff]  ;;  %v268_v5 = vld [vmem:[%s249_s4] sm:$0xff]  ;;  %v267_v6 = vmul.f32 0.17677669, %v266_v3  ;;  %s234_s27 = scalar_lea.vmem [#allocation5], %s500_s18  ;;  %s387_s29 = sshll.u32 %s383_s26, 4  ;;  %s388_s29 = int_to_ptr.hbm [resolvable:$true] %s387_s29 }
  0x1a   : > { %v272_v15 = vld [vmem:[%s256_s10] sm:$0xff]  ;;  %s385_s28 = sshll.u32 %s234_s27, 4  ;;  %s593_s4 = sshra.s32 %s388_s29, 4  ;;  %s386_s28 = int_to_ptr.vmem [resolvable:$true] %s385_s28  ;;  %s594_s4 = int_to_ptr.hbm [resolvable:$true] %s593_s4 }
  0x1b   : > { %290 = vmatpush.msra.mxu0 %v270_v2  ;;  %347 = vmatpush.msra.mxu1 %v272_v15  ;;  %s595_s5 = scalar_lea.hbm %s594_s4, 8  ;;  %s599_s7 = scalar_lea.hbm %s807_s3, 64 }
  0x1c   : > { %v314_v23 = vld [vmem:[#allocation3] sm:$0xff]  ;;  %p596_p12 = scmp.ne.s32.totalorder %s594_s4, %s595_s5  ;;  %p600_p1 = scmp.lt.s32.totalorder %s594_s4, %s807_s3 }
  0x1d   : > { %291 = vmatpush.msra.mxu0 %v269_v4  ;;  %v322_v31 = vld [vmem:[#allocation4] sm:$0xff]  ;;  %p601_p2 = scmp.lt.s32.totalorder %s599_s7, %s595_s5 }
  0x1e   : > { %v297_v11 = vld [vmem:[#allocation2] sm:$0xff]  ;;  %p597_p13 = pnand %p596_p12, %p722_p4 }
  0x1f   : > { %292 = vmatpush.msra.mxu0 %v268_v5  ;;  %p602_p3 = por %p601_p2, %p600_p1 }
  0x20   : > { %505 = vmatmul.msk.f32.vlgmr.msra.gmra.mxu0 %vm264_vm1, %v267_v6  ;;  %p598_p0 = pneg %p597_p13 }
  0x22   : > { %p603_p5 = pnand %p602_p3, %p598_p0 }
  0x9d   : > { %v294_v8 = vpop.f32.mrf.mxu0 }
  0x9e   : > { %v299_v9 = vsel %vm298_vm2, %v294_v8, -inf }
  0x9f   : > { %300 = vmax.xlane.f32.xlu0 %v299_v9 }
 0x112   : > { %v301_v12 = vpop.xlane.xlu0 %300 }
 0x113   : > { %v302_v13 = vmax.f32 %v297_v11, %v301_v12 }
 0x115   : > { %v303_v14 = vsub.f32 %v297_v11, %v302_v13  ;;  %354 = vst.msk [vmem:[#allocation2] sm:$0xff] %vm261_vm0, %v302_v13  ;;  %308 = vperm.xlu0 %570, %v302_v13  }
 0x117   : > { %v304_v21 = vmul.f32 1.442695, %v303_v14 }
 0x187   : > { %v309_v16 = vpop.permute.xlu0 %308 }
 0x188   : > { %v311_v17 = vsub.f32 %v294_v8, %v309_v16 }
 0x18a   : > { %v312_v18 = vmul.f32 1.442695, %v311_v17 }
 0x18c   : > { %573 = vpow2.f32 %v312_v18 }
 0x18d   : > { %575 = vpow2.f32 %v304_v21 }
 0x192   : > { %v574_v19 = vpop.eup %573 }
 0x193   : > { %506 = vmatmul.msk.f32.vlgmr.msra.gmra.mxu1 %vm298_vm2, %v574_v19  ;;  %v316_v20 = vsel %vm298_vm2, %v574_v19, 0.0  ;;  %v576_v22 = vpop.eup %575 }
 0x194   : > { %317 = vadd.xlane.f32.xlu1 %v316_v20  ;;  %v315_v24 = vmul.f32 %v576_v22, %v314_v23 }
 0x1ad   : > { %325 = vperm.xlu1 %571, %v576_v22  }
 0x207   : > { %v318_v25 = vpop.xlane.xlu1 %317 }
 0x208   : > { %v319_v26 = vadd.f32 %v318_v25, %v315_v24 }
 0x20a   : > { %321 = vst.msk [vmem:[#allocation3] sm:$0xff] %vm261_vm0, %v319_v26 }
 0x210   : > { %v349_v35 = vpop.f32.mrf.mxu1 }
 0x211   : > { %v358_v27 = vld [vmem:[#allocation3] sm:$0xff] }
 0x212   : > { %577 = vrcp.f32 %v358_v27 }
 0x218   : > { %v578_v28 = vpop.eup %577 }
 0x219   : > { %v360_v29 = vmul.f32 %v578_v28, %v358_v27 }
 0x21b   : > { %v361_v30 = vsub.f32 2.0, %v360_v29 }
 0x21d   : > { %v362_v32 = vmul.f32 %v578_v28, %v361_v30 }
 0x21f   : > { %v326_v33 = vpop.permute.xlu1 %325  ;;  %366 = vperm.xlu2 %572, %v362_v32  }
 0x220   : > { %v328_v34 = vmul.f32 %v326_v33, %v322_v31 }
 0x222   : > { %v352_v36 = vadd.f32 %v349_v35, %v328_v34 }
 0x224   : > { %353 = vst.msk [vmem:[#allocation4] sm:$0xff] %vm264_vm1, %v352_v36 }
 0x22b   : > { %v363_v37 = vld [vmem:[#allocation4] sm:$0xff] }
 0x279   : > { %v367_v38 = vpop.permute.xlu2 %366 }
 0x27a   : > { %v369_v39 = vmul.f32 %v367_v38, %v363_v37 }
 0x27c   : > { %370 = vst.msk [vmem:[%s234_s27] sm:$0xff] %vm264_vm1, %v369_v39 }
 0x27d   : > { %606 = shalt.err (!%p603_p5)
}
 0x27e   : > { %512 = dma.vmem_to_hbm [thread:$0]  (%p722_p4), %s386_s28, 128, %s388_s29, %s372_s30  }
 0x27f PF: > { %p518_p6 = scmp.ge.s32.totalorder %s657_s17, 2  ;;  %s399_s10 = sand.u32 1, %s637_s12  }
 0x280   : > { %s400_s11 = scalar_lea.sflag [#allocation6], %s399_s10 }
 0x281   : > { %p515_p7 = pnand %p518_p6, %p729_p8 }
 0x283   : > { %p516_p9 = pneg %p515_p7 }
 0x285   : > { %632 = dma.done.wait (%p516_p9), %s400_s11, 128  }
 0x286   : > { %634 = vsyncadd (%p516_p9), %s400_s11, 4294967168  ;;  %s16_s17 = sadd.s32 1, %s657_s17   ;;  %s810_s12 = smov %s641_s13 }
 0x287   : > { %p13_p10 = scmp.ge.s32.totalorder %s16_s17, 10   ;;  %s811_s13 = smov %s645_s14 }
 0x288   : > { %s812_s14 = smov %s735_s25  ;;  %s813_s15 = smov %s653_s16 }
 0x289   : > { %s814_s16 = smov %s816_s20  ;;  %15 = sbr.rel (!%p13_p10) target bundleno = 4 (0x4), region = 81 }
 0x28e   :  { %406 = vsyncpa [#allocation6], 1 }
 0x28f   :  { %408 = vsyncpa [#allocation6 + $0x1], 1 }

</bundles_post_ra>
